<compile_context>
chip_gen: v7x
topology: tpu7x:2x2x1
jax: 0.10.0
libtpu: 0.0.40
codegen_flags: <defaults>
</compile_context>

<pallas_src>
import jax
import jax.numpy as jnp
from jax.experimental import pallas as pl
from jax.experimental.pallas import tpu as pltpu


def _round_up(n: int, m: int) -> int:
    return ((n + m - 1) // m) * m


def classifier_kernel(x_ref, w1b1_ref, w2b2_ref, o_ref):
    r_pad = w2b2_ref.shape[0] - 1          # padded hidden dim (multiple of 128)

    x = x_ref[...]                          # (tm, 1)
    w1 = w1b1_ref[0:1, :]                   # (1, R_pad)
    b1 = w1b1_ref[1:2, :]                   # (1, R_pad)

    # Pre-logits: Linear(1, R) + Tanh. K=1 contraction == broadcast multiply on the VPU;
    # tanh goes to the EUP slot. Padded lanes stay exactly zero (tanh(0) == 0).
    h = jnp.tanh(x * w1 + b1)               # (tm, R_pad)

    # Output projection: Linear(R, C) on the MXU (lane-dense K and N).
    w2 = w2b2_ref[0:r_pad, :]               # (R_pad, C_pad)
    b2 = w2b2_ref[r_pad:r_pad + 1, :]       # (1, C_pad)
    logits = jnp.dot(h, w2, preferred_element_type=jnp.float32)
    o_ref[...] = (logits + b2).astype(o_ref.dtype)


def pack_classifier_params(w1, b1, w2, b2):
    """Pack (w1, b1, w2, b2) into two lane-dense VMEM-friendly arrays (done once)."""
    R, C = w2.shape
    r_pad = _round_up(R, 128)
    c_pad = _round_up(C, 128)

    w1b1 = jnp.zeros((2, r_pad), dtype=jnp.float32)
    w1b1 = w1b1.at[0, :R].set(jnp.reshape(w1, (R,)))
    w1b1 = w1b1.at[1, :R].set(jnp.reshape(b1, (R,)))

    w2b2 = jnp.zeros((r_pad + 1, c_pad), dtype=jnp.float32)
    w2b2 = w2b2.at[:R, :C].set(w2)
    w2b2 = w2b2.at[r_pad, :C].set(jnp.reshape(b2, (C,)))
    return w1b1, w2b2


def classifier_forward(x, w1b1, w2b2, num_classes, *, block_b=512):
    """x: (B, 1) class-token scalar per example. Returns (B, num_classes) logits."""
    B = x.shape[0]
    c_pad = w2b2.shape[1]

    tm = min(block_b, _round_up(B, 8))      # batch tile (>=8, <=block_b)
    b_pad = _round_up(B, tm)
    if b_pad != B:
        x = jnp.pad(x, ((0, b_pad - B), (0, 0)))

    out = pl.pallas_call(
        classifier_kernel,
        out_shape=jax.ShapeDtypeStruct((b_pad, c_pad), jnp.float32),
        grid_spec=pltpu.PrefetchScalarGridSpec(
            num_scalar_prefetch=0,
            grid=(b_pad // tm,),
            in_specs=[
                pl.BlockSpec((tm, 1), lambda i: (i, 0)),          # batch-tiled x
                pl.BlockSpec(w1b1.shape, lambda i: (0, 0)),       # resident params
                pl.BlockSpec(w2b2.shape, lambda i: (0, 0)),       # resident params
            ],
            out_specs=pl.BlockSpec((tm, c_pad), lambda i: (i, 0)),
        ),
        compiler_params=pltpu.CompilerParams(
            dimension_semantics=("parallel",),                    # megacore-shard batch
        ),
    )(x, w1b1, w2b2)

    return out[:B, :num_classes]


def reference_forward(x, w1, b1, w2, b2):
    h = jnp.tanh(x @ w1 + b1)
    return h @ w2 + b2


if __name__ == "__main__":
    B = 8                      # batch
    REPRESENTATION_SIZE = 32   # hidden dim of the pre-logits MLP
    NUM_CLASSES = 16           # output classes

    key = jax.random.PRNGKey(0)
    k_x, k_w1, k_b1, k_w2, k_b2 = jax.random.split(key, 5)

    # deterministic synthetic parameters (shapes follow nn.Linear(1, R) / nn.Linear(R, C),
    # weights stored transposed vs. torch: w1=[1,R], w2=[R,C])
    x = jax.random.normal(k_x, (B, 1), dtype=jnp.float32)
    w1 = jax.random.normal(k_w1, (1, REPRESENTATION_SIZE), dtype=jnp.float32) * 0.5
    b1 = jax.random.normal(k_b1, (1, REPRESENTATION_SIZE), dtype=jnp.float32) * 0.1
    w2 = jax.random.normal(k_w2, (REPRESENTATION_SIZE, NUM_CLASSES), dtype=jnp.float32) * 0.2
    b2 = jax.random.normal(k_b2, (1, NUM_CLASSES), dtype=jnp.float32) * 0.1

    # Pack parameters once (model-init-time cost, not per forward call).
    w1b1, w2b2 = pack_classifier_params(w1, b1, w2, b2)

    out = classifier_forward(x, w1b1, w2b2, NUM_CLASSES)
    out = jax.block_until_ready(out)

    ref = reference_forward(x, w1, b1, w2, b2)
    assert out.shape == (B, NUM_CLASSES)
    assert jnp.allclose(out, ref, atol=1e-5, rtol=1e-5), "mismatch vs. pure-JAX reference"

    # TODO(synk): for production, fuse this head into the preceding pooling/encoder Pallas
    # kernel to remove the standalone pallas_call launch entirely.
    print("KERNEL_OK")
</pallas_src>

<mosaic_0001>
module attributes {stable_mosaic.version = 11 : i64} {
  func.func @classifier_kernel(%arg0: i32, %arg1: memref<8x1xf32, #tpu.memory_space<vmem>>, %arg2: memref<2x128xf32, #tpu.memory_space<vmem>>, %arg3: memref<129x128xf32, #tpu.memory_space<vmem>>, %arg4: memref<8x128xf32, #tpu.memory_space<vmem>>) attributes {dimension_semantics = [#tpu.dimension_semantics<parallel>], iteration_bounds = array<i64: 1>, scalar_prefetch = 0 : i64, scratch_operands = 0 : i64, tpu.core_type = #tpu.core_type<tc>, window_params = [{transform_indices = @transform_0, window_bounds = array<i64: 8, 1>}, {pipeline_mode = #tpu.pipeline_mode<synchronous>, transform_indices = @transform_1, window_bounds = array<i64: 2, 128>}, {pipeline_mode = #tpu.pipeline_mode<synchronous>, transform_indices = @transform_2, window_bounds = array<i64: 129, 128>}, {transform_indices = @transform_3, window_bounds = array<i64: 8, 128>}]} {
    %c0 = arith.constant 0 : index
    %c0_0 = arith.constant 0 : index
    %0 = vector.load %arg1[%c0, %c0_0] : memref<8x1xf32, #tpu.memory_space<vmem>>, vector<8x1xf32>
    %c0_1 = arith.constant 0 : index
    %c0_2 = arith.constant 0 : index
    %1 = vector.load %arg2[%c0_1, %c0_2] : memref<2x128xf32, #tpu.memory_space<vmem>>, vector<1x128xf32>
    %c1 = arith.constant 1 : index
    %c0_3 = arith.constant 0 : index
    %2 = vector.load %arg2[%c1, %c0_3] : memref<2x128xf32, #tpu.memory_space<vmem>>, vector<1x128xf32>
    %3 = vector.broadcast %0 : vector<8x1xf32> to vector<8x128xf32>
    %4 = vector.broadcast %1 : vector<1x128xf32> to vector<8x128xf32>
    %5 = arith.mulf %3, %4 : vector<8x128xf32>
    %6 = vector.broadcast %2 : vector<1x128xf32> to vector<8x128xf32>
    %7 = arith.addf %5, %6 : vector<8x128xf32>
    %8 = math.tanh %7 : vector<8x128xf32>
    %c0_4 = arith.constant 0 : index
    %c0_5 = arith.constant 0 : index
    %9 = vector.load %arg3[%c0_4, %c0_5] : memref<129x128xf32, #tpu.memory_space<vmem>>, vector<128x128xf32>
    %c128 = arith.constant 128 : index
    %c0_6 = arith.constant 0 : index
    %10 = vector.load %arg3[%c128, %c0_6] : memref<129x128xf32, #tpu.memory_space<vmem>>, vector<1x128xf32>
    %cst = arith.constant dense<0.000000e+00> : vector<8x128xf32>
    %11 = tpu.matmul %8, %9, %cst {dimension_numbers = #tpu.dot_dimension_numbers<[1], [0], [0], [1], [0, 0, 1, 1], [], []>} : vector<8x128xf32>, vector<128x128xf32>, vector<8x128xf32> -> vector<8x128xf32>
    %12 = vector.broadcast %10 : vector<1x128xf32> to vector<8x128xf32>
    %13 = arith.addf %11, %12 : vector<8x128xf32>
    %c0_7 = arith.constant 0 : index
    %c0_8 = arith.constant 0 : index
    %14 = vector.load %arg4[%c0_7, %c0_8] : memref<8x128xf32, #tpu.memory_space<vmem>>, vector<8x128xf32>
    tpu.vector_store %arg4[%c0_7, %c0_8], %13 {strides = array<i32>} : memref<8x128xf32, #tpu.memory_space<vmem>>, vector<8x128xf32>,
    return
  }
  func.func @transform_0(%arg0: i32) -> (i32, i32) {
    %c0_i32 = arith.constant 0 : i32
    %c0_i32_0 = arith.constant 0 : i32
    return %arg0, %c0_i32 : i32, i32
  }
  func.func @transform_1(%arg0: i32) -> (i32, i32) {
    %c0_i32 = arith.constant 0 : i32
    %c0_i32_0 = arith.constant 0 : i32
    %c0_i32_1 = arith.constant 0 : i32
    return %c0_i32, %c0_i32_0 : i32, i32
  }
  func.func @transform_2(%arg0: i32) -> (i32, i32) {
    %c0_i32 = arith.constant 0 : i32
    %c0_i32_0 = arith.constant 0 : i32
    %c0_i32_1 = arith.constant 0 : i32
    return %c0_i32, %c0_i32_0 : i32, i32
  }
  func.func @transform_3(%arg0: i32) -> (i32, i32) {
    %c0_i32 = arith.constant 0 : i32
    %c0_i32_0 = arith.constant 0 : i32
    return %arg0, %c0_i32 : i32, i32
  }
}

</mosaic_0001>

<bundles_post_ra>
// kernel: tpu_custom_call.1
= control target key start
LH: loop header
LB: loop body
LE: loop exit
PB: predicated region body
PF: predicated region fallthrough
CT: control target
= control target key end

     0   :  { %8 = vsyncpa [#allocation3], 0  ;;  %s354_s0 = inlined_call_operand.vmem [shape: f32[8,1], index: 0, kind: input, shape index: {}]   ;;  %s355_s1 = inlined_call_operand.vmem [shape: f32[2,128], index: 1, kind: input, shape index: {}]   ;;  %s356_s2 = inlined_call_operand.hbm [shape: f32[129,128], index: 2, kind: input, shape index: {}]   ;;  %s357_s3 = inlined_call_operand.hbm [shape: f32[8,128], index: 3, kind: output, shape index: {}]  }
   0x1   :  { %9 = vsyncpa [#allocation4], 0  ;;  %s293_s12 = smov [#allocation2]   ;;  %s245_s16 = scalar_lea.hbm %s356_s2, 2176 }
   0x2   :  { %s19_s13 = sshll.u32 %s293_s12, 4  ;;  %p246_p0 = scmp.ne.s32.totalorder %s356_s2, %s245_s16  ;;  %s20_s13 = int_to_ptr.vmem [resolvable:$true] %s19_s13 }
   0x3   :  { %p249_p1 = scmp.lt.u32.totalorder %s245_s16, %s356_s2 }
   0x5   :  { %p251_p2 = pnand %p249_p1, %p246_p0 }
   0x7   :  { %254 = shalt.err (!%p251_p2)
}
   0x8   :  { %s255_s21 = scalar_lea.vmem %s20_s13, 2176  ;;  %p260_p4 = scmp.lt.s32.totalorder %s20_s13, %s20_s13 }
   0x9   :  { %p256_p3 = scmp.ne.s32.totalorder %s20_s13, %s255_s21  ;;  %p261_p5 = scmp.lt.s32.totalorder %s255_s21, %s255_s21 }
   0xb   :  { %p262_p6 = por %p261_p5, %p260_p4 }
   0xd   :  { %p263_p7 = pnand %p262_p6, %p256_p3 }
   0xf   :  { %266 = shalt.err (!%p263_p7)
}
  0x10   :  { %s294_s22 = smov 128   ;;  %s295_s23 = smov 8  }
  0x11   :  { %25 = dma.hbm_to_vmem [thread:$0]  %s356_s2, 2176, %s20_s13, [#allocation3], %s294_s22, %s294_s22, %s295_s23  }
  0x12   :  { %289 = dma.done.wait [#allocation3], 2176  }
  0x13   :  { %290 = vsyncadd [#allocation3], 4294965120  ;;  %v296_v0 = vmov 0   ;;  %v297_v1 = vmov 0.0|0.0   ;;  %v29_v2 = vld [vmem:[%s354_s0] sm:$0xff]  ;;  %v48_v3 = vld [vmem:[#allocation2] sm:$0xff] }
  0x14   :  { %242 = vset.pattern.permute.xlu0 %v296_v0  ;;  %210 = vmatprep.subr.bf16.mxu0 %v297_v1  ;;  %v49_v4 = vld [vmem:[#allocation2 + $0x8] sm:$0xff]  ;;  %v50_v6 = vld [vmem:[#allocation2 + $0x10] sm:$0xff]  ;;  %v51_v7 = vld [vmem:[#allocation2 + $0x18] sm:$0xff]  ;;  %vm298_vm0 = vmmov 0   ;;  %v299_v11 = vmov 0.0   ;;  %s300_s30 = smov [#allocation5]  }
  0x15   :  { %34 = vperm.xlu0 %242, %v29_v2   ;;  %v211_v5 = vpack.c.bf16 %v49_v4, %v48_v3  ;;  %v214_v8 = vpack.c.bf16 %v51_v7, %v50_v6  ;;  %v52_v9 = vld [vmem:[#allocation2 + $0x20] sm:$0xff]  ;;  %v53_v10 = vld [vmem:[#allocation2 + $0x28] sm:$0xff]  ;;  %207 = vmatprep.mubr.msk.f32.mxu0 %vm298_vm0, %v299_v11  ;;  %v54_v13 = vld [vmem:[#allocation2 + $0x30] sm:$0xff]  ;;  %s146_s4 = sshll.u32 %s300_s30, 4  ;;  %s147_s4 = int_to_ptr.vmem [resolvable:$true] %s146_s4 }
  0x16   :  { %v217_v12 = vpack.c.bf16 %v53_v10, %v52_v9  ;;  %v55_v14 = vld [vmem:[#allocation2 + $0x38] sm:$0xff]  ;;  %v56_v16 = vld [vmem:[#allocation2 + $0x40] sm:$0xff]  ;;  %v57_v17 = vld [vmem:[#allocation2 + $0x48] sm:$0xff]  ;;  %s267_s5 = scalar_lea.vmem %s147_s4, 128  ;;  %p272_p9 = scmp.lt.s32.totalorder %s147_s4, %s147_s4 }
  0x17   :  { %212 = vmatpush3.bf16.msra.mxu0 %v211_v5  ;;  %v220_v15 = vpack.c.bf16 %v55_v14, %v54_v13  ;;  %v223_v18 = vpack.c.bf16 %v57_v17, %v56_v16  ;;  %v58_v19 = vld [vmem:[#allocation2 + $0x50] sm:$0xff]  ;;  %v59_v20 = vld [vmem:[#allocation2 + $0x58] sm:$0xff]  ;;  %v60_v22 = vld [vmem:[#allocation2 + $0x60] sm:$0xff]  ;;  %p268_p8 = scmp.ne.s32.totalorder %s147_s4, %s267_s5  ;;  %p273_p10 = scmp.lt.s32.totalorder %s267_s5, %s267_s5 }
  0x18   :  { %213 = vmatprep.subr.bf16.mxu0 %v297_v1  ;;  %v226_v21 = vpack.c.bf16 %v59_v20, %v58_v19  ;;  %v61_v23 = vld [vmem:[#allocation2 + $0x68] sm:$0xff]  ;;  %v62_v25 = vld [vmem:[#allocation2 + $0x70] sm:$0xff]  ;;  %v63_v26 = vld [vmem:[#allocation2 + $0x78] sm:$0xff] }
  0x19   :  { %v229_v24 = vpack.c.bf16 %v61_v23, %v60_v22  ;;  %v232_v27 = vpack.c.bf16 %v63_v26, %v62_v25  ;;  %v155_v28 = vld [vmem:[%s355_s1] ss:$0 sm:$0xff]  ;;  %v156_v29 = vld [vmem:[%s355_s1 + $0x1] ss:$0 sm:$0xff]  ;;  %v157_v34 = vld [vmem:[#allocation2 + $0x80] ss:$0 sm:$0xff]  ;;  %p274_p11 = por %p273_p10, %p272_p9 }
  0x1b   :  { %215 = vmatpush3.bf16.msra.mxu0 %v214_v8  ;;  %p275_p12 = pnand %p274_p11, %p268_p8 }
  0x1c   :  { %216 = vmatprep.subr.bf16.mxu0 %v297_v1 }
  0x1f   :  { %218 = vmatpush3.bf16.msra.mxu0 %v217_v12 }
  0x20   :  { %219 = vmatprep.subr.bf16.mxu0 %v297_v1 }
  0x23   :  { %221 = vmatpush3.bf16.msra.mxu0 %v220_v15 }
  0x24   :  { %222 = vmatprep.subr.bf16.mxu0 %v297_v1 }
  0x27   :  { %224 = vmatpush3.bf16.msra.mxu0 %v223_v18 }
  0x28   :  { %225 = vmatprep.subr.bf16.mxu0 %v297_v1 }
  0x2b   :  { %227 = vmatpush3.bf16.msra.mxu0 %v226_v21 }
  0x2c   :  { %228 = vmatprep.subr.bf16.mxu0 %v297_v1 }
  0x2f   :  { %230 = vmatpush3.bf16.msra.mxu0 %v229_v24 }
  0x30   :  { %231 = vmatprep.subr.bf16.mxu0 %v297_v1 }
  0x33   :  { %233 = vmatpush3.bf16.msra.mxu0 %v232_v27 }
  0x94   :  { %v35_v30 = vpop.permute.xlu0 %34 }
  0x95   :  { %v41_v31 = vmul.f32 %v155_v28, %v35_v30 }
  0x97   :  { %v46_v32 = vadd.f32 %v156_v29, %v41_v31 }
  0x99   :  { %243 = vtanh.f32 %v46_v32 }
  0xa3   :  { %v244_v33 = vpop.eup %243 }
  0xa4   :  { %208 = vmatmul.mubr.f32.vlgmr.msra.gmra.mrb[0].mxu0 %v244_v33 }
 0x177   :  { %v135_v35 = vpop.f32.mrb[0].mxu0 }
 0x178   :  { %v136_v36 = vadd.f32 %v157_v34, %v135_v35  ;;  %v209_v37 = vpop.f32.mrb[1].mxu0 }
 0x17a   :  { %139 = vst [vmem:[#allocation5] sm:$0xff] %v136_v36 }
 0x17b   :  { %278 = shalt.err (!%p275_p12)
}
 0x17c   :  { %s279_s7 = scalar_lea.hbm %s357_s3, 128 }
 0x17d   :  { %p280_p13 = scmp.ne.s32.totalorder %s357_s3, %s279_s7  ;;  %p283_p0 = scmp.lt.u32.totalorder %s279_s7, %s357_s3 }
 0x17f   :  { %p285_p1 = pnand %p283_p0, %p280_p13 }
 0x181   :  { %288 = shalt.err (!%p285_p1)
}
 0x182   :  { %149 = dma.vmem_to_hbm [thread:$0]  %s147_s4, 128, %s357_s3, [#allocation4]  }
 0x183   :  { %291 = dma.done.wait [#allocation4], 128  }
 0x184   :  { %292 = vsyncadd [#allocation4], 4294967168 }
 0x185   :  { %153 = vsyncpa [#allocation3], 1 }
 0x186   :  { %154 = vsyncpa [#allocation4], 1 }

</bundles_post_ra>
